<compile_context>
chip_gen: v7x
topology: tpu7x:2x2x1
jax: 0.10.0
libtpu: 0.0.40
codegen_flags: <defaults>
</compile_context>

<pallas_src>
import math

import jax
import jax.numpy as jnp
from jax import lax
from jax.experimental import pallas as pl
from jax.experimental.pallas import tpu as pltpu


def rope_emb_kernel(coef_ref, emb_ref):
    """Write one (tile_rows, width) slab of the folded RoPE table.

    coef_ref : (2, width) float32 in VMEM.
               row 0 = fold * tile(inv_freq_full, fold)          (per-lane scale)
               row 1 = (lane // dim) * tile(inv_freq_full, fold) (per-lane offset)
    emb_ref  : (tile_rows, width) float32 output tile, width = fold * dim.

    Folded layout: flat element (r, g*dim + d) of the folded table corresponds to
    position s = r*fold + g and frequency index d of the unfolded (seq, dim) table,
    i.e.  emb[r, c] = (r*fold + c//dim) * inv[c % dim] = r*scale[c] + offset[c].
    """
    rows, width = emb_ref.shape
    row0 = pl.program_id(0) * rows  # first folded row handled by this tile
    row = lax.broadcasted_iota(jnp.int32, (rows, width), 0) + row0
    # Pure VPU broadcast FMA; store is lane-dense (width is a multiple of 128).
    emb_ref[...] = row.astype(jnp.float32) * coef_ref[0:1, :] + coef_ref[1:2, :]


def make_inv_freq(dim, base=10000.0):
    """Deterministic parameter setup, identical to the PyTorch __init__."""
    return 1.0 / (base ** (jnp.arange(0, dim, 2, dtype=jnp.float32) / dim))


def _pick_tile_rows(rows_total, width, max_tile_bytes):
    """Row-tile size: as big as possible subject to the tile-byte budget so the
    double-buffered output (2 x tile) stays under every chip's scoped-VMEM default
    (v5e 16 MiB is the tightest) while amortizing the ~0.35 us per-step overhead."""
    if rows_total <= 8:
        return rows_total
    cap = max(8, max_tile_bytes // (width * 4))
    if cap >= rows_total:
        return rows_total            # full extent along rows is always legal
    return max(8, (cap // 8) * 8)    # otherwise must be a multiple of 8


def rotary_embedding_forward(x, inv_freq, seq_len=None, max_tile_bytes=4 << 20):
    """Pallas-backed equivalent of RotaryEmbedding.forward -> (seq_len, dim) f32."""
    if seq_len is None:
        seq_len = x.shape[1]
    half = inv_freq.shape[0]
    dim = 2 * half

    # Pre-duplicate inv_freq to the full `dim` (no in-kernel concatenate).
    inv_full = jnp.concatenate([inv_freq, inv_freq]).astype(jnp.float32)

    # Lane-dense folding: smallest fold such that fold*dim is a multiple of 128.
    # dim % 128 == 0 -> fold = 1;  dim = 32 -> fold = 4;  dim = 192 -> fold = 2; ...
    fold = 128 // math.gcd(dim, 128)
    width = fold * dim
    rows_total = -(-seq_len // fold)

    # Hoisted per-lane coefficients: emb[r, c] = r * scale[c] + offset[c].
    inv_tiled = jnp.tile(inv_full, fold)                                  # (width,)
    scale = float(fold) * inv_tiled                                       # (width,)
    offset = (jnp.arange(width) // dim).astype(jnp.float32) * inv_tiled   # (width,)
    coef = jnp.stack([scale, offset], axis=0)                             # (2, width)

    tile_r = _pick_tile_rows(rows_total, width, max_tile_bytes)
    num_tiles = -(-rows_total // tile_r)

    emb_folded = pl.pallas_call(
        rope_emb_kernel,
        out_shape=jax.ShapeDtypeStruct((rows_total, width), jnp.float32),
        grid=(num_tiles,),
        in_specs=[pl.BlockSpec((2, width), lambda i: (0, 0))],
        out_specs=pl.BlockSpec((tile_r, width), lambda i: (i, 0)),
        compiler_params=pltpu.CompilerParams(
            dimension_semantics=("parallel",)),  # let v7x's 2 TCs split row tiles
    )(coef)

    # Row-major unfold back to (seq_len, dim); the folded HBM bytes ARE the
    # row-major (rows_total*fold, dim) table, so the reshape is a free view.
    emb = emb_folded.reshape(rows_total * fold, dim)
    if rows_total * fold != seq_len:
        # Only taken when seq_len % fold != 0 (costs one extra HBM read+write).
        # TODO(synk): consumers could accept the fold-padded table to avoid this copy.
        emb = emb[:seq_len]
    return emb


def rotary_embedding_forward_ref(x, inv_freq, seq_len=None):
    """Pure-JAX reference, mirrors the PyTorch forward exactly."""
    if seq_len is None:
        seq_len = x.shape[1]
    t = jnp.arange(seq_len, dtype=inv_freq.dtype)
    freqs = jnp.outer(t, inv_freq)
    return jnp.concatenate([freqs, freqs], axis=-1)


if __name__ == "__main__":
    # Small shapes consistent with the module: batch=2, seq=8, hidden dim=32.
    batch, seq, dim = 2, 8, 32
    key = jax.random.PRNGKey(0)
    x = jax.random.normal(key, (batch, seq, dim), dtype=jnp.float32)

    inv_freq = make_inv_freq(dim, base=10000.0)  # shape (dim//2,) = (16,)

    emb = rotary_embedding_forward(x, inv_freq)
    emb = jax.block_until_ready(emb)

    emb_ref = rotary_embedding_forward_ref(x, inv_freq)
    assert emb.shape == (seq, dim)
    assert emb.dtype == jnp.float32
    assert jnp.allclose(emb, emb_ref, atol=1e-6, rtol=1e-6)

    # Coverage: seq_len not a multiple of the lane-fold (slicing fallback path).
    emb2 = jax.block_until_ready(rotary_embedding_forward(x, inv_freq, seq_len=10))
    assert jnp.allclose(emb2, rotary_embedding_forward_ref(x, inv_freq, seq_len=10),
                        atol=1e-6, rtol=1e-6)

    # Coverage: dim >= 128 (fold == 1, lane-dense by construction).
    inv_freq128 = make_inv_freq(128)
    emb3 = jax.block_until_ready(rotary_embedding_forward(x, inv_freq128, seq_len=16))
    assert jnp.allclose(emb3, rotary_embedding_forward_ref(x, inv_freq128, seq_len=16),
                        atol=1e-6, rtol=1e-6)

    # Coverage: dim that is not a divisor of 128 (generalized fold: dim=48 -> fold=8).
    inv_freq48 = make_inv_freq(48)
    emb4 = jax.block_until_ready(rotary_embedding_forward(x, inv_freq48, seq_len=24))
    assert jnp.allclose(emb4, rotary_embedding_forward_ref(x, inv_freq48, seq_len=24),
                        atol=1e-6, rtol=1e-6)

    print("KERNEL_OK")
</pallas_src>

<mosaic_0001>
module attributes {stable_mosaic.version = 11 : i64} {
  func.func @rope_emb_kernel(%arg0: i32, %arg1: memref<2x128xf32, #tpu.memory_space<vmem>>, %arg2: memref<2x128xf32, #tpu.memory_space<vmem>>) attributes {dimension_semantics = [#tpu.dimension_semantics<parallel>], iteration_bounds = array<i64: 1>, scalar_prefetch = 0 : i64, scratch_operands = 0 : i64, tpu.core_type = #tpu.core_type<tc>, window_params = [{pipeline_mode = #tpu.pipeline_mode<synchronous>, transform_indices = @transform_0, window_bounds = array<i64: 2, 128>}, {transform_indices = @transform_1, window_bounds = array<i64: 2, 128>}]} {
    %c2_i32 = arith.constant 2 : i32
    %0 = arith.muli %arg0, %c2_i32 : i32
    %1 = tpu.iota {dimensions = array<i32: 0>} : vector<2x128xi32>
    %2 = vector.broadcast %0 : i32 to vector<2x128xi32>
    %3 = arith.addi %1, %2 : vector<2x128xi32>
    %4 = arith.sitofp %3 : vector<2x128xi32> to vector<2x128xf32>
    %c0 = arith.constant 0 : index
    %c0_0 = arith.constant 0 : index
    %5 = vector.load %arg1[%c0, %c0_0] : memref<2x128xf32, #tpu.memory_space<vmem>>, vector<1x128xf32>
    %6 = vector.broadcast %5 : vector<1x128xf32> to vector<2x128xf32>
    %7 = arith.mulf %4, %6 : vector<2x128xf32>
    %c1 = arith.constant 1 : index
    %c0_1 = arith.constant 0 : index
    %8 = vector.load %arg1[%c1, %c0_1] : memref<2x128xf32, #tpu.memory_space<vmem>>, vector<1x128xf32>
    %9 = vector.broadcast %8 : vector<1x128xf32> to vector<2x128xf32>
    %10 = arith.addf %7, %9 : vector<2x128xf32>
    %c0_2 = arith.constant 0 : index
    %c0_3 = arith.constant 0 : index
    %11 = vector.load %arg2[%c0_2, %c0_3] : memref<2x128xf32, #tpu.memory_space<vmem>>, vector<2x128xf32>
    tpu.vector_store %arg2[%c0_2, %c0_3], %10 {strides = array<i32>} : memref<2x128xf32, #tpu.memory_space<vmem>>, vector<2x128xf32>,
    return
  }
  func.func @transform_0(%arg0: i32) -> (i32, i32) {
    %c0_i32 = arith.constant 0 : i32
    %c0_i32_0 = arith.constant 0 : i32
    %c0_i32_1 = arith.constant 0 : i32
    return %c0_i32, %c0_i32_0 : i32, i32
  }
  func.func @transform_1(%arg0: i32) -> (i32, i32) {
    %c0_i32 = arith.constant 0 : i32
    %c0_i32_0 = arith.constant 0 : i32
    return %arg0, %c0_i32 : i32, i32
  }
}

</mosaic_0001>

<bundles_post_ra>
// kernel: tpu_custom_call.1
= control target key start
LH: loop header
LB: loop body
LE: loop exit
PB: predicated region body
PF: predicated region fallthrough
CT: control target
= control target key end

     0   :  { %6 = vsyncpa [#allocation3], 0  ;;  %s143_s0 = inlined_call_operand.hbm [shape: f32[2,128], index: 0, kind: input, shape index: {}]   ;;  %s144_s1 = inlined_call_operand.hbm [shape: f32[2,128], index: 1, kind: output, shape index: {}]  }
   0x1   :  { %7 = vsyncpa [#allocation4], 0  ;;  %s107_s6 = smov [#allocation2]   ;;  %s59_s10 = scalar_lea.hbm %s143_s0, 32 }
   0x2   :  { %s14_s7 = sshll.u32 %s107_s6, 4  ;;  %p60_p0 = scmp.ne.s32.totalorder %s143_s0, %s59_s10  ;;  %s15_s7 = int_to_ptr.vmem [resolvable:$true] %s14_s7 }
   0x3   :  { %p63_p1 = scmp.lt.u32.totalorder %s59_s10, %s143_s0 }
   0x5   :  { %p65_p2 = pnand %p63_p1, %p60_p0 }
   0x7   :  { %68 = shalt.err (!%p65_p2)
}
   0x8   :  { %s69_s15 = scalar_lea.vmem %s15_s7, 32  ;;  %p74_p4 = scmp.lt.s32.totalorder %s15_s7, %s15_s7 }
   0x9   :  { %p70_p3 = scmp.ne.s32.totalorder %s15_s7, %s69_s15  ;;  %p75_p5 = scmp.lt.s32.totalorder %s69_s15, %s69_s15 }
   0xb   :  { %p76_p6 = por %p75_p5, %p74_p4 }
   0xd   :  { %p77_p7 = pnand %p76_p6, %p70_p3 }
   0xf   :  { %80 = shalt.err (!%p77_p7)
}
  0x10   :  { %17 = dma.hbm_to_vmem [thread:$0]  %s143_s0, 32, %s15_s7, [#allocation3]  }
  0x11   :  { %103 = dma.done.wait [#allocation3], 32  }
  0x12   :  { %104 = vsyncadd [#allocation3], 4294967264  ;;  %v22_v0 = vlaneseq  ;;  %v55_v3 = vld [vmem:[#allocation2] ss:$0 sm:$0xff]  ;;  %v56_v4 = vld [vmem:[#allocation2 + $0x1] ss:$0 sm:$0xff] }
  0x13   :  { %s108_s18 = smov [#allocation5]  }
  0x14   :  { %v23_v1 = vshrl.u32 %v22_v0, 7  ;;  %s46_s19 = sshll.u32 %s108_s18, 4  ;;  %s47_s19 = int_to_ptr.vmem [resolvable:$true] %s46_s19 }
  0x15   :  { %s81_s20 = scalar_lea.vmem %s47_s19, 32  ;;  %p86_p9 = scmp.lt.s32.totalorder %s47_s19, %s47_s19 }
  0x16   :  { %v26_v2 = vcvt.s32.f32 %v23_v1  ;;  %p82_p8 = scmp.ne.s32.totalorder %s47_s19, %s81_s20  ;;  %p87_p10 = scmp.lt.s32.totalorder %s81_s20, %s81_s20 }
  0x18   :  { %v32_v5 = vmul.f32 %v55_v3, %v26_v2  ;;  %p88_p11 = por %p87_p10, %p86_p9 }
  0x1a   :  { %v38_v6 = vadd.f32 %v56_v4, %v32_v5  ;;  %p89_p12 = pnand %p88_p11, %p82_p8 }
  0x1c   :  { %39 = vst [vmem:[#allocation5] sm:$0x3] %v38_v6 }
  0x1d   :  { %92 = shalt.err (!%p89_p12)
}
  0x1e   :  { %s93_s22 = scalar_lea.hbm %s144_s1, 32 }
  0x1f   :  { %p94_p13 = scmp.ne.s32.totalorder %s144_s1, %s93_s22  ;;  %p97_p0 = scmp.lt.u32.totalorder %s93_s22, %s144_s1 }
  0x21   :  { %p99_p1 = pnand %p97_p0, %p94_p13 }
  0x23   :  { %102 = shalt.err (!%p99_p1)
}
  0x24   :  { %49 = dma.vmem_to_hbm [thread:$0]  %s47_s19, 32, %s144_s1, [#allocation4]  }
  0x25   :  { %105 = dma.done.wait [#allocation4], 32  }
  0x26   :  { %106 = vsyncadd [#allocation4], 4294967264 }
  0x27   :  { %53 = vsyncpa [#allocation3], 1 }
  0x28   :  { %54 = vsyncpa [#allocation4], 1 }

</bundles_post_ra>
